<compile_context>
chip_gen: v7x
topology: tpu7x:2x2x1
jax: 0.10.0
libtpu: 0.0.40
codegen_flags: <defaults>
</compile_context>

<pallas_src>
import math

import jax
import jax.numpy as jnp
from jax.experimental import pallas as pl
from jax.experimental.pallas import tpu as pltpu


def _featurewise_norm_kernel(x_ref, scale_ref, bias_ref, o_ref):
    # Pure mem-bound elementwise affine: (x - mean) / std == x * scale + bias.
    # Compute in f32 (free on the VPU for a DMA-bound kernel), cast on store.
    x = x_ref[...].astype(jnp.float32)
    o_ref[...] = (x * scale_ref[...] + bias_ref[...]).astype(o_ref.dtype)


def _round_down(a: int, b: int) -> int:
    return (a // b) * b


def featurewise_normalization(x, mean, std, *, target_block_bytes=4 * 1024 * 1024):
    """Compute (x - mean) / std with mean/std broadcast over the last axis.

    x    : [..., F]
    mean : [F]  (per-feature)
    std  : [F]  (per-feature, nonzero)
    """
    mean = jnp.asarray(mean)
    std = jnp.asarray(std)

    orig_shape = x.shape
    F = orig_shape[-1]
    out_dtype = x.dtype

    # Affine parameters in f32 for accuracy: one reciprocal per feature
    # instead of N*F divides. Note: x*(1/std) + (-mean/std) is not bit-exact
    # vs (x - mean)/std (one extra rounding), fine at ~1e-7 relative in f32.
    scale32 = 1.0 / std.astype(jnp.float32)
    bias32 = -mean.astype(jnp.float32) * scale32

    x2d = x.reshape(-1, F)
    N = x2d.shape[0]

    # Lane folding: make the block's last dim a multiple of 128 lanes so
    # stores are unmasked full-width vst -- but only when it is a free
    # contiguous reshape (no padding) and the fold factor is sane.
    if F % 128 == 0:
        k = 1
    else:
        k = 128 // math.gcd(F, 128)
        if k > 8 or N % k != 0 or N == 0:
            # Fallback: unfolded, full-F last dim. Masked lane stores are
            # cheaper than the pad + slice HBM round trips folding would need.
            k = 1

    block_f = k * F
    n_rows = N // k if k > 1 else N

    if k > 1:
        x2d = x2d.reshape(n_rows, block_f)  # free row-major reshape
        scale_row = jnp.tile(scale32, k).reshape(1, block_f)
        bias_row = jnp.tile(bias32, k).reshape(1, block_f)
    else:
        scale_row = scale32.reshape(1, block_f)
        bias_row = bias32.reshape(1, block_f)

    # Row tile: ~target_block_bytes per block, dtype-aware sublane multiple
    # (8 for 32-bit, 16 for 16-bit, 32 for 8-bit packing).
    itemsize = jnp.dtype(out_dtype).itemsize
    sub_mult = 8 * max(1, 4 // itemsize)
    rows_per_block = max(1, target_block_bytes // max(1, block_f * itemsize))
    row_tile = max(sub_mult, _round_down(rows_per_block, sub_mult))

    if n_rows <= sub_mult:
        # Block second-to-last dim equals the full array dim (always legal).
        row_tile = max(1, n_rows)
    else:
        # Keep at least 2 grid steps so v7x's 2 TensorCores both get work;
        # never exceed the array extent.
        cap = max(sub_mult, _round_down((n_rows + 1) // 2, sub_mult))
        row_tile = min(row_tile, cap)

    grid = (pl.cdiv(n_rows, row_tile),)

    out = pl.pallas_call(
        _featurewise_norm_kernel,
        out_shape=jax.ShapeDtypeStruct((n_rows, block_f), out_dtype),
        grid_spec=pltpu.PrefetchScalarGridSpec(
            num_scalar_prefetch=0,
            grid=grid,
            in_specs=[
                pl.BlockSpec((row_tile, block_f), lambda i: (i, 0)),
                pl.BlockSpec((1, block_f), lambda i: (0, 0)),
                pl.BlockSpec((1, block_f), lambda i: (0, 0)),
            ],
            out_specs=pl.BlockSpec((row_tile, block_f), lambda i: (i, 0)),
        ),
        compiler_params=pltpu.CompilerParams(
            dimension_semantics=("parallel",),
            # 4 MiB blocks, double-buffered in + out (~16 MiB) + f32 param
            # rows: comfortable under v7x's 64 MiB physical VMEM and above
            # v5e's 16 MiB scoped default.
            vmem_limit_bytes=48 * 1024 * 1024,
        ),
    )(x2d, scale_row, bias_row)

    # Free contiguous reshapes only -- no pad, no slice.
    return out.reshape(orig_shape)


if __name__ == "__main__":
    key = jax.random.PRNGKey(0)

    # Small shapes consistent with the module: batch=2, seq=8, features=32.
    B, S, F = 2, 8, 32
    x = jax.random.normal(key, (B, S, F), dtype=jnp.float32)

    # Deterministic per-feature parameters (module __init__ takes python lists
    # of length F; synthesized here, no checkpoint load).
    mean = jnp.linspace(-1.0, 1.0, F, dtype=jnp.float32)
    std = jnp.linspace(0.5, 2.0, F, dtype=jnp.float32)  # strictly positive

    out = featurewise_normalization(x, mean, std)
    out = jax.block_until_ready(out)

    # Reference check against plain JAX broadcasting semantics.
    ref = (x - mean) / std
    assert out.shape == x.shape
    assert out.dtype == x.dtype
    assert jnp.allclose(out, ref, atol=1e-5, rtol=1e-5)

    print("KERNEL_OK")
</pallas_src>

<mosaic_0001>
module attributes {stable_mosaic.version = 11 : i64} {
  func.func @_featurewise_norm_kernel(%arg0: i32, %arg1: memref<4x128xf32, #tpu.memory_space<vmem>>, %arg2: memref<1x128xf32, #tpu.memory_space<vmem>>, %arg3: memref<1x128xf32, #tpu.memory_space<vmem>>, %arg4: memref<4x128xf32, #tpu.memory_space<vmem>>) attributes {dimension_semantics = [#tpu.dimension_semantics<parallel>], iteration_bounds = array<i64: 1>, scalar_prefetch = 0 : i64, scratch_operands = 0 : i64, tpu.core_type = #tpu.core_type<tc>, window_params = [{transform_indices = @transform_0, window_bounds = array<i64: 4, 128>}, {pipeline_mode = #tpu.pipeline_mode<synchronous>, transform_indices = @transform_1, window_bounds = array<i64: 1, 128>}, {pipeline_mode = #tpu.pipeline_mode<synchronous>, transform_indices = @transform_2, window_bounds = array<i64: 1, 128>}, {transform_indices = @transform_3, window_bounds = array<i64: 4, 128>}]} {
    %c0 = arith.constant 0 : index
    %c0_0 = arith.constant 0 : index
    %0 = vector.load %arg1[%c0, %c0_0] : memref<4x128xf32, #tpu.memory_space<vmem>>, vector<4x128xf32>
    %c0_1 = arith.constant 0 : index
    %c0_2 = arith.constant 0 : index
    %1 = vector.load %arg2[%c0_1, %c0_2] : memref<1x128xf32, #tpu.memory_space<vmem>>, vector<1x128xf32>
    %2 = vector.broadcast %1 : vector<1x128xf32> to vector<4x128xf32>
    %3 = arith.mulf %0, %2 : vector<4x128xf32>
    %c0_3 = arith.constant 0 : index
    %c0_4 = arith.constant 0 : index
    %4 = vector.load %arg3[%c0_3, %c0_4] : memref<1x128xf32, #tpu.memory_space<vmem>>, vector<1x128xf32>
    %5 = vector.broadcast %4 : vector<1x128xf32> to vector<4x128xf32>
    %6 = arith.addf %3, %5 : vector<4x128xf32>
    %c0_5 = arith.constant 0 : index
    %c0_6 = arith.constant 0 : index
    %7 = vector.load %arg4[%c0_5, %c0_6] : memref<4x128xf32, #tpu.memory_space<vmem>>, vector<4x128xf32>
    tpu.vector_store %arg4[%c0_5, %c0_6], %6 {strides = array<i32>} : memref<4x128xf32, #tpu.memory_space<vmem>>, vector<4x128xf32>,
    return
  }
  func.func @transform_0(%arg0: i32) -> (i32, i32) {
    %c0_i32 = arith.constant 0 : i32
    %c0_i32_0 = arith.constant 0 : i32
    return %arg0, %c0_i32 : i32, i32
  }
  func.func @transform_1(%arg0: i32) -> (i32, i32) {
    %c0_i32 = arith.constant 0 : i32
    %c0_i32_0 = arith.constant 0 : i32
    %c0_i32_1 = arith.constant 0 : i32
    return %c0_i32, %c0_i32_0 : i32, i32
  }
  func.func @transform_2(%arg0: i32) -> (i32, i32) {
    %c0_i32 = arith.constant 0 : i32
    %c0_i32_0 = arith.constant 0 : i32
    %c0_i32_1 = arith.constant 0 : i32
    return %c0_i32, %c0_i32_0 : i32, i32
  }
  func.func @transform_3(%arg0: i32) -> (i32, i32) {
    %c0_i32 = arith.constant 0 : i32
    %c0_i32_0 = arith.constant 0 : i32
    return %arg0, %c0_i32 : i32, i32
  }
}

</mosaic_0001>

<bundles_post_ra>
// kernel: tpu_custom_call.1
= control target key start
LH: loop header
LB: loop body
LE: loop exit
PB: predicated region body
PF: predicated region fallthrough
CT: control target
= control target key end

     0   :  { %8 = vsyncpa [#allocation3], 0  ;;  %s164_s0 = inlined_call_operand.hbm [shape: f32[4,128], index: 0, kind: input, shape index: {}]   ;;  %s165_s1 = inlined_call_operand.vmem [shape: f32[1,128], index: 1, kind: input, shape index: {}]   ;;  %s166_s2 = inlined_call_operand.vmem [shape: f32[1,128], index: 2, kind: input, shape index: {}]   ;;  %s167_s3 = inlined_call_operand.hbm [shape: f32[4,128], index: 3, kind: output, shape index: {}]  }
   0x1   :  { %9 = vsyncpa [#allocation4], 0  ;;  %s112_s12 = smov [#allocation2]   ;;  %s64_s16 = scalar_lea.hbm %s164_s0, 64 }
   0x2   :  { %s16_s13 = sshll.u32 %s112_s12, 4  ;;  %p65_p0 = scmp.ne.s32.totalorder %s164_s0, %s64_s16  ;;  %s17_s13 = int_to_ptr.vmem [resolvable:$true] %s16_s13 }
   0x3   :  { %p68_p1 = scmp.lt.u32.totalorder %s64_s16, %s164_s0 }
   0x5   :  { %p70_p2 = pnand %p68_p1, %p65_p0 }
   0x7   :  { %73 = shalt.err (!%p70_p2)
}
   0x8   :  { %s74_s21 = scalar_lea.vmem %s17_s13, 64  ;;  %p79_p4 = scmp.lt.s32.totalorder %s17_s13, %s17_s13 }
   0x9   :  { %p75_p3 = scmp.ne.s32.totalorder %s17_s13, %s74_s21  ;;  %p80_p5 = scmp.lt.s32.totalorder %s74_s21, %s74_s21 }
   0xb   :  { %p81_p6 = por %p80_p5, %p79_p4 }
   0xd   :  { %p82_p7 = pnand %p81_p6, %p75_p3 }
   0xf   :  { %85 = shalt.err (!%p82_p7)
}
  0x10   :  { %19 = dma.hbm_to_vmem [thread:$0]  %s164_s0, 64, %s17_s13, [#allocation3]  }
  0x11   :  { %108 = dma.done.wait [#allocation3], 64  }
  0x12   :  { %109 = vsyncadd [#allocation3], 4294967232  ;;  %s113_s24 = smov [#allocation5]   ;;  %v27_v0 = vld [vmem:[#allocation2] sm:$0xf] }
  0x13   :  { %s51_s25 = sshll.u32 %s113_s24, 4  ;;  %v60_v1 = vld [vmem:[%s165_s1] ss:$0 sm:$0xff]  ;;  %s52_s25 = int_to_ptr.vmem [resolvable:$true] %s51_s25 }
  0x14   :  { %v61_v2 = vld [vmem:[%s166_s2] ss:$0 sm:$0xff]  ;;  %v35_v3 = vmul.f32 %v60_v1, %v27_v0  ;;  %s86_s30 = scalar_lea.vmem %s52_s25, 64  ;;  %p91_p9 = scmp.lt.s32.totalorder %s52_s25, %s52_s25 }
  0x15   :  { %p87_p8 = scmp.ne.s32.totalorder %s52_s25, %s86_s30  ;;  %p92_p10 = scmp.lt.s32.totalorder %s86_s30, %s86_s30 }
  0x16   :  { %v43_v4 = vadd.f32 %v61_v2, %v35_v3 }
  0x17   :  { %p93_p11 = por %p92_p10, %p91_p9 }
  0x18   :  { %44 = vst [vmem:[#allocation5] sm:$0xf] %v43_v4 }
  0x19   :  { %p94_p12 = pnand %p93_p11, %p87_p8 }
  0x1b   :  { %97 = shalt.err (!%p94_p12)
}
  0x1c   :  { %s98_s5 = scalar_lea.hbm %s167_s3, 64 }
  0x1d   :  { %p99_p13 = scmp.ne.s32.totalorder %s167_s3, %s98_s5  ;;  %p102_p0 = scmp.lt.u32.totalorder %s98_s5, %s167_s3 }
  0x1f   :  { %p104_p1 = pnand %p102_p0, %p99_p13 }
  0x21   :  { %107 = shalt.err (!%p104_p1)
}
  0x22   :  { %54 = dma.vmem_to_hbm [thread:$0]  %s52_s25, 64, %s167_s3, [#allocation4]  }
  0x23   :  { %110 = dma.done.wait [#allocation4], 64  }
  0x24   :  { %111 = vsyncadd [#allocation4], 4294967232 }
  0x25   :  { %58 = vsyncpa [#allocation3], 1 }
  0x26   :  { %59 = vsyncpa [#allocation4], 1 }

</bundles_post_ra>
